<compile_context>
chip_gen: v5e
topology: v5e:2x2
jax: 0.10.0
libtpu: 0.0.40
codegen_flags: <defaults>
</compile_context>

<pallas_src>
import functools

import jax
import jax.numpy as jnp
from jax.experimental import pallas as pl
from jax.experimental.pallas import tpu as pltpu

_IN_EPS = 1e-5      # InstanceNorm2d eps from the module spec
_NEG_SLOPE = 0.01   # nn.LeakyReLU default negative_slope


def _round_up(x, m):
    return (x + m - 1) // m * m


def _plain_block_kernel(x_ref, w_ref, g_ref, bt_ref, m_ref, o_ref,
                        *, tap_starts, l_out, inv_hw):
    """Fused 3x3 conv (9 shifted GEMMs) + InstanceNorm2d(affine) + LeakyReLU.

    x_ref  : (1, C_in, L_ext)   bf16 zero-padded, halo'd, lane-flattened input
    w_ref  : (9, T_CO, C_in)    bf16 per-tap conv weights (tap t = dy*3 + dx)
    g_ref  : (T_CO, 1)          f32 InstanceNorm gamma
    bt_ref : (T_CO, 1)          f32 InstanceNorm beta
    m_ref  : (1, L_out)         f32 validity mask (1 at real HxW pixels, else 0)
    o_ref  : (1, T_CO, L_out)   output over the padded flat grid (cropped by wrapper)
    """
    # Conv2d(3x3, pad=1) as 9 shifted MXU matmuls, accumulated in f32.
    acc = jnp.dot(w_ref[0], x_ref[0, :, pl.ds(tap_starts[0], l_out)],
                  preferred_element_type=jnp.float32)
    for t in range(1, len(tap_starts)):
        acc += jnp.dot(w_ref[t], x_ref[0, :, pl.ds(tap_starts[t], l_out)],
                       preferred_element_type=jnp.float32)

    # InstanceNorm2d: single-pass masked stats over the valid spatial positions.
    mask = m_ref[...]                                    # (1, L_out)
    ym = acc * mask                                      # zero out padding/garbage
    s1 = jnp.sum(ym, axis=-1, keepdims=True)             # (T_CO, 1) sum
    s2 = jnp.sum(ym * acc, axis=-1, keepdims=True)       # (T_CO, 1) sum of squares
    mean = s1 * inv_hw
    var = jnp.maximum(s2 * inv_hw - mean * mean, 0.0)
    # rsqrt on the EUP, once per channel; fused affine -> one pass over the tile.
    scale = jax.lax.rsqrt(var + _IN_EPS) * g_ref[...]
    shift = bt_ref[...] - mean * scale
    z = acc * scale + shift

    # LeakyReLU(0.01) as max(z, 0.01*z): mul+max instead of cmp+mul+select.
    o_ref[0] = jnp.maximum(z, _NEG_SLOPE * z).astype(o_ref.dtype)


def plain_block_forward(x, conv_w, conv_b, gamma, beta, *, gemm_dtype=jnp.bfloat16):
    """Pallas forward of PlainBlock (2-D, stride=1, instance norm, no dropout).

    x      : (N, C_in, H, W)  NCHW
    conv_w : (C_out, C_in, K, K)
    conv_b, gamma, beta : (C_out,)
    returns: (N, C_out, H, W)
    """
    N, C_in, H, W = x.shape
    C_out, c_in_w, K, K2 = conv_w.shape
    assert c_in_w == C_in and K == K2 == 3, "only the 3x3 default kernel is supported"
    # The per-channel conv bias is exactly cancelled by InstanceNorm's mean
    # subtraction, so it is dropped (saves a DMA stream and an HW-wide add).
    del conv_b

    pad = (K - 1) // 2
    Hp, Wp = H + 2 * pad, W + 2 * pad
    HW = H * W
    L_out = _round_up(Hp * Wp, 128)              # lane-dense output width
    halo = pad * (Wp + 1)                        # max |tap offset| into the flat grid
    L_ext = _round_up(L_out + 2 * halo, 128)     # input window length incl. halos

    # ---- wrapper-side layout plumbing (single ~1.3-1.6x padded copy, no im2col) ----
    xp = jnp.pad(x, ((0, 0), (0, 0), (pad, pad), (pad, pad)))       # (N,C_in,Hp,Wp)
    xf = xp.reshape(N, C_in, Hp * Wp).astype(gemm_dtype)
    x_ext = jnp.pad(xf, ((0, 0), (0, 0), (halo, L_ext - Hp * Wp - halo)))

    # per-tap weights, tap index t = dy*K + dx  ->  w_taps[t][co, ci] = w[co, ci, dy, dx]
    w_taps = jnp.transpose(conv_w, (2, 3, 0, 1)).reshape(K * K, C_out, C_in)
    w_taps = w_taps.astype(gemm_dtype)
    g2 = gamma.reshape(C_out, 1).astype(jnp.float32)
    bt2 = beta.reshape(C_out, 1).astype(jnp.float32)

    # validity mask over the padded flat grid (1 at positions holding a real pixel)
    p = jnp.arange(L_out)
    i, j = p // Wp, p % Wp
    mask = ((i >= pad) & (i < pad + H) & (j >= pad) & (j < pad + W) & (p < Hp * Wp))
    mask = mask.astype(jnp.float32).reshape(1, L_out)

    # static lane-window starts: halo + (dy-pad)*Wp + (dx-pad) = dy*Wp + dx
    tap_starts = tuple(dy * Wp + dx for dy in range(K) for dx in range(K))

    # ---- C_out tiling: bound VMEM, keep >=2 parallel grid steps for megacore ----
    if C_out <= 128:
        t_co = C_out
        if N < 2 and C_out % 16 == 0:
            t_co = C_out // 2            # give v7x's second TensorCore some work
    elif C_out % 128 == 0:
        t_co = 128
    else:
        t_co = C_out
        for cand in range(128, 7, -8):
            if C_out % cand == 0:
                t_co = cand
                break
    n_co = C_out // t_co

    itemsize_out = x.dtype.itemsize
    cost = pl.CostEstimate(
        flops=2 * N * C_out * C_in * K * K * HW,
        transcendentals=N * C_out,
        bytes_accessed=(N * C_in * L_ext * 2          # bf16 input (read once / batch)
                        + K * K * C_out * C_in * 2    # bf16 weights
                        + N * C_out * L_out * itemsize_out),
    )

    kernel = functools.partial(_plain_block_kernel, tap_starts=tap_starts,
                               l_out=L_out, inv_hw=1.0 / HW)

    out = pl.pallas_call(
        kernel,
        out_shape=jax.ShapeDtypeStruct((N, C_out, L_out), x.dtype),
        grid_spec=pltpu.PrefetchScalarGridSpec(
            num_scalar_prefetch=0,
            grid=(N, n_co),
            in_specs=[
                pl.BlockSpec((1, C_in, L_ext), lambda n, c: (n, 0, 0)),     # input
                pl.BlockSpec((K * K, t_co, C_in), lambda n, c: (0, c, 0)),  # weights
                pl.BlockSpec((t_co, 1), lambda n, c: (c, 0)),               # gamma
                pl.BlockSpec((t_co, 1), lambda n, c: (c, 0)),               # beta
                pl.BlockSpec((1, L_out), lambda n, c: (0, 0)),              # mask
            ],
            out_specs=pl.BlockSpec((1, t_co, L_out), lambda n, c: (n, c, 0)),
        ),
        compiler_params=pltpu.CompilerParams(
            dimension_semantics=("parallel", "parallel"),
            vmem_limit_bytes=64 * 1024 * 1024,   # within v7x physical, above defaults
        ),
        cost_estimate=cost,
    )(x_ext, w_taps, g2, bt2, mask)

    # crop the padded flat grid back to (N, C_out, H, W)
    out = out[:, :, :Hp * Wp].reshape(N, C_out, Hp, Wp)
    return out[:, :, pad:pad + H, pad:pad + W]


if __name__ == "__main__":
    key = jax.random.PRNGKey(0)
    k_x, k_w, k_b, k_g, k_bt = jax.random.split(key, 5)

    # Small shapes consistent with a UNet PlainBlock: batch=2, in=4, out=8, 16x16.
    N, C_in, C_out, H, W = 2, 4, 8, 16, 16
    K = 3

    def _q(a):
        # Round-trip through bf16 so the bf16 MXU products are exact and the kernel
        # can be checked against the f32 XLA reference with a tight tolerance.
        return a.astype(jnp.bfloat16).astype(jnp.float32)

    x = _q(jax.random.normal(k_x, (N, C_in, H, W), dtype=jnp.float32))
    conv_w = _q(jax.random.normal(k_w, (C_out, C_in, K, K), dtype=jnp.float32)
                * (1.0 / (C_in * K * K) ** 0.5))
    conv_b = _q(0.1 * jax.random.normal(k_b, (C_out,), dtype=jnp.float32))
    gamma = _q(1.0 + 0.1 * jax.random.normal(k_g, (C_out,), dtype=jnp.float32))
    beta = _q(0.1 * jax.random.normal(k_bt, (C_out,), dtype=jnp.float32))

    y = plain_block_forward(x, conv_w, conv_b, gamma, beta)
    y = jax.block_until_ready(y)

    # ---- pure-JAX reference (Conv2d+bias -> InstanceNorm2d(affine) -> LeakyReLU) ----
    conv = jax.lax.conv_general_dilated(
        x, conv_w, window_strides=(1, 1), padding=((1, 1), (1, 1)),
        dimension_numbers=("NCHW", "OIHW", "NCHW"),
    ) + conv_b.reshape(1, C_out, 1, 1)
    mean = jnp.mean(conv, axis=(2, 3), keepdims=True)
    var = jnp.mean((conv - mean) ** 2, axis=(2, 3), keepdims=True)
    normed = (conv - mean) / jnp.sqrt(var + _IN_EPS)
    normed = normed * gamma.reshape(1, C_out, 1, 1) + beta.reshape(1, C_out, 1, 1)
    ref = jnp.where(normed >= 0, normed, _NEG_SLOPE * normed)

    assert y.shape == ref.shape and y.dtype == ref.dtype
    max_err = float(jnp.max(jnp.abs(y - ref)))
    assert jnp.allclose(y, ref, atol=2e-3, rtol=2e-3), f"mismatch vs reference: {max_err}"

    print("KERNEL_OK")
</pallas_src>

<mosaic_0001>
module attributes {stable_mosaic.version = 11 : i64} {
  func.func @_plain_block_kernel(%arg0: i32, %arg1: i32, %arg2: memref<1x4x512xbf16, #tpu.memory_space<vmem>>, %arg3: memref<9x8x4xbf16, #tpu.memory_space<vmem>>, %arg4: memref<8x1xf32, #tpu.memory_space<vmem>>, %arg5: memref<8x1xf32, #tpu.memory_space<vmem>>, %arg6: memref<1x384xf32, #tpu.memory_space<vmem>>, %arg7: memref<1x8x384xf32, #tpu.memory_space<vmem>>) attributes {dimension_semantics = [#tpu.dimension_semantics<parallel>, #tpu.dimension_semantics<parallel>], iteration_bounds = array<i64: 2, 1>, scalar_prefetch = 0 : i64, scratch_operands = 0 : i64, tpu.core_type = #tpu.core_type<tc>, window_params = [{transform_indices = @transform_0, window_bounds = array<i64: 1, 4, 512>}, {transform_indices = @transform_1, window_bounds = array<i64: 9, 8, 4>}, {transform_indices = @transform_2, window_bounds = array<i64: 8, 1>}, {transform_indices = @transform_3, window_bounds = array<i64: 8, 1>}, {pipeline_mode = #tpu.pipeline_mode<synchronous>, transform_indices = @transform_4, window_bounds = array<i64: 1, 384>}, {transform_indices = @transform_5, window_bounds = array<i64: 1, 8, 384>}]} {
    %c0 = arith.constant 0 : index
    %c0_0 = arith.constant 0 : index
    %c0_1 = arith.constant 0 : index
    %0 = vector.load %arg3[%c0, %c0_0, %c0_1] : memref<9x8x4xbf16, #tpu.memory_space<vmem>>, vector<1x8x4xbf16>
    %1 = vector.shape_cast %0 : vector<1x8x4xbf16> to vector<8x4xbf16>
    %c0_2 = arith.constant 0 : index
    %c0_3 = arith.constant 0 : index
    %c0_4 = arith.constant 0 : index
    %2 = vector.load %arg2[%c0_2, %c0_3, %c0_4] : memref<1x4x512xbf16, #tpu.memory_space<vmem>>, vector<1x4x384xbf16>
    %3 = vector.shape_cast %2 : vector<1x4x384xbf16> to vector<4x384xbf16>
    %cst = arith.constant dense<0.000000e+00> : vector<8x384xf32>
    %4 = tpu.matmul %1, %3, %cst {dimension_numbers = #tpu.dot_dimension_numbers<[1], [0], [0], [1], [0, 0, 1, 1], [], []>} : vector<8x4xbf16>, vector<4x384xbf16>, vector<8x384xf32> -> vector<8x384xf32>
    %c1 = arith.constant 1 : index
    %c0_5 = arith.constant 0 : index
    %c0_6 = arith.constant 0 : index
    %5 = vector.load %arg3[%c1, %c0_5, %c0_6] : memref<9x8x4xbf16, #tpu.memory_space<vmem>>, vector<1x8x4xbf16>
    %6 = vector.shape_cast %5 : vector<1x8x4xbf16> to vector<8x4xbf16>
    %c0_7 = arith.constant 0 : index
    %c0_8 = arith.constant 0 : index
    %c1_9 = arith.constant 1 : index
    %7 = vector.load %arg2[%c0_7, %c0_8, %c1_9] : memref<1x4x512xbf16, #tpu.memory_space<vmem>>, vector<1x4x384xbf16>
    %8 = vector.shape_cast %7 : vector<1x4x384xbf16> to vector<4x384xbf16>
    %cst_10 = arith.constant dense<0.000000e+00> : vector<8x384xf32>
    %9 = tpu.matmul %6, %8, %cst_10 {dimension_numbers = #tpu.dot_dimension_numbers<[1], [0], [0], [1], [0, 0, 1, 1], [], []>} : vector<8x4xbf16>, vector<4x384xbf16>, vector<8x384xf32> -> vector<8x384xf32>
    %10 = arith.addf %4, %9 : vector<8x384xf32>
    %c2 = arith.constant 2 : index
    %c0_11 = arith.constant 0 : index
    %c0_12 = arith.constant 0 : index
    %11 = vector.load %arg3[%c2, %c0_11, %c0_12] : memref<9x8x4xbf16, #tpu.memory_space<vmem>>, vector<1x8x4xbf16>
    %12 = vector.shape_cast %11 : vector<1x8x4xbf16> to vector<8x4xbf16>
    %c0_13 = arith.constant 0 : index
    %c0_14 = arith.constant 0 : index
    %c2_15 = arith.constant 2 : index
    %13 = vector.load %arg2[%c0_13, %c0_14, %c2_15] : memref<1x4x512xbf16, #tpu.memory_space<vmem>>, vector<1x4x384xbf16>
    %14 = vector.shape_cast %13 : vector<1x4x384xbf16> to vector<4x384xbf16>
    %cst_16 = arith.constant dense<0.000000e+00> : vector<8x384xf32>
    %15 = tpu.matmul %12, %14, %cst_16 {dimension_numbers = #tpu.dot_dimension_numbers<[1], [0], [0], [1], [0, 0, 1, 1], [], []>} : vector<8x4xbf16>, vector<4x384xbf16>, vector<8x384xf32> -> vector<8x384xf32>
    %16 = arith.addf %10, %15 : vector<8x384xf32>
    %c3 = arith.constant 3 : index
    %c0_17 = arith.constant 0 : index
    %c0_18 = arith.constant 0 : index
    %17 = vector.load %arg3[%c3, %c0_17, %c0_18] : memref<9x8x4xbf16, #tpu.memory_space<vmem>>, vector<1x8x4xbf16>
    %18 = vector.shape_cast %17 : vector<1x8x4xbf16> to vector<8x4xbf16>
    %c0_19 = arith.constant 0 : index
    %c0_20 = arith.constant 0 : index
    %c18 = arith.constant 18 : index
    %19 = vector.load %arg2[%c0_19, %c0_20, %c18] : memref<1x4x512xbf16, #tpu.memory_space<vmem>>, vector<1x4x384xbf16>
    %20 = vector.shape_cast %19 : vector<1x4x384xbf16> to vector<4x384xbf16>
    %cst_21 = arith.constant dense<0.000000e+00> : vector<8x384xf32>
    %21 = tpu.matmul %18, %20, %cst_21 {dimension_numbers = #tpu.dot_dimension_numbers<[1], [0], [0], [1], [0, 0, 1, 1], [], []>} : vector<8x4xbf16>, vector<4x384xbf16>, vector<8x384xf32> -> vector<8x384xf32>
    %22 = arith.addf %16, %21 : vector<8x384xf32>
    %c4 = arith.constant 4 : index
    %c0_22 = arith.constant 0 : index
    %c0_23 = arith.constant 0 : index
    %23 = vector.load %arg3[%c4, %c0_22, %c0_23] : memref<9x8x4xbf16, #tpu.memory_space<vmem>>, vector<1x8x4xbf16>
    %24 = vector.shape_cast %23 : vector<1x8x4xbf16> to vector<8x4xbf16>
    %c0_24 = arith.constant 0 : index
    %c0_25 = arith.constant 0 : index
    %c19 = arith.constant 19 : index
    %25 = vector.load %arg2[%c0_24, %c0_25, %c19] : memref<1x4x512xbf16, #tpu.memory_space<vmem>>, vector<1x4x384xbf16>
    %26 = vector.shape_cast %25 : vector<1x4x384xbf16> to vector<4x384xbf16>
    %cst_26 = arith.constant dense<0.000000e+00> : vector<8x384xf32>
    %27 = tpu.matmul %24, %26, %cst_26 {dimension_numbers = #tpu.dot_dimension_numbers<[1], [0], [0], [1], [0, 0, 1, 1], [], []>} : vector<8x4xbf16>, vector<4x384xbf16>, vector<8x384xf32> -> vector<8x384xf32>
    %28 = arith.addf %22, %27 : vector<8x384xf32>
    %c5 = arith.constant 5 : index
    %c0_27 = arith.constant 0 : index
    %c0_28 = arith.constant 0 : index
    %29 = vector.load %arg3[%c5, %c0_27, %c0_28] : memref<9x8x4xbf16, #tpu.memory_space<vmem>>, vector<1x8x4xbf16>
    %30 = vector.shape_cast %29 : vector<1x8x4xbf16> to vector<8x4xbf16>
    %c0_29 = arith.constant 0 : index
    %c0_30 = arith.constant 0 : index
    %c20 = arith.constant 20 : index
    %31 = vector.load %arg2[%c0_29, %c0_30, %c20] : memref<1x4x512xbf16, #tpu.memory_space<vmem>>, vector<1x4x384xbf16>
    %32 = vector.shape_cast %31 : vector<1x4x384xbf16> to vector<4x384xbf16>
    %cst_31 = arith.constant dense<0.000000e+00> : vector<8x384xf32>
    %33 = tpu.matmul %30, %32, %cst_31 {dimension_numbers = #tpu.dot_dimension_numbers<[1], [0], [0], [1], [0, 0, 1, 1], [], []>} : vector<8x4xbf16>, vector<4x384xbf16>, vector<8x384xf32> -> vector<8x384xf32>
    %34 = arith.addf %28, %33 : vector<8x384xf32>
    %c6 = arith.constant 6 : index
    %c0_32 = arith.constant 0 : index
    %c0_33 = arith.constant 0 : index
    %35 = vector.load %arg3[%c6, %c0_32, %c0_33] : memref<9x8x4xbf16, #tpu.memory_space<vmem>>, vector<1x8x4xbf16>
    %36 = vector.shape_cast %35 : vector<1x8x4xbf16> to vector<8x4xbf16>
    %c0_34 = arith.constant 0 : index
    %c0_35 = arith.constant 0 : index
    %c36 = arith.constant 36 : index
    %37 = vector.load %arg2[%c0_34, %c0_35, %c36] : memref<1x4x512xbf16, #tpu.memory_space<vmem>>, vector<1x4x384xbf16>
    %38 = vector.shape_cast %37 : vector<1x4x384xbf16> to vector<4x384xbf16>
    %cst_36 = arith.constant dense<0.000000e+00> : vector<8x384xf32>
    %39 = tpu.matmul %36, %38, %cst_36 {dimension_numbers = #tpu.dot_dimension_numbers<[1], [0], [0], [1], [0, 0, 1, 1], [], []>} : vector<8x4xbf16>, vector<4x384xbf16>, vector<8x384xf32> -> vector<8x384xf32>
    %40 = arith.addf %34, %39 : vector<8x384xf32>
    %c7 = arith.constant 7 : index
    %c0_37 = arith.constant 0 : index
    %c0_38 = arith.constant 0 : index
    %41 = vector.load %arg3[%c7, %c0_37, %c0_38] : memref<9x8x4xbf16, #tpu.memory_space<vmem>>, vector<1x8x4xbf16>
    %42 = vector.shape_cast %41 : vector<1x8x4xbf16> to vector<8x4xbf16>
    %c0_39 = arith.constant 0 : index
    %c0_40 = arith.constant 0 : index
    %c37 = arith.constant 37 : index
    %43 = vector.load %arg2[%c0_39, %c0_40, %c37] : memref<1x4x512xbf16, #tpu.memory_space<vmem>>, vector<1x4x384xbf16>
    %44 = vector.shape_cast %43 : vector<1x4x384xbf16> to vector<4x384xbf16>
    %cst_41 = arith.constant dense<0.000000e+00> : vector<8x384xf32>
    %45 = tpu.matmul %42, %44, %cst_41 {dimension_numbers = #tpu.dot_dimension_numbers<[1], [0], [0], [1], [0, 0, 1, 1], [], []>} : vector<8x4xbf16>, vector<4x384xbf16>, vector<8x384xf32> -> vector<8x384xf32>
    %46 = arith.addf %40, %45 : vector<8x384xf32>
    %c8 = arith.constant 8 : index
    %c0_42 = arith.constant 0 : index
    %c0_43 = arith.constant 0 : index
    %47 = vector.load %arg3[%c8, %c0_42, %c0_43] : memref<9x8x4xbf16, #tpu.memory_space<vmem>>, vector<1x8x4xbf16>
    %48 = vector.shape_cast %47 : vector<1x8x4xbf16> to vector<8x4xbf16>
    %c0_44 = arith.constant 0 : index
    %c0_45 = arith.constant 0 : index
    %c38 = arith.constant 38 : index
    %49 = vector.load %arg2[%c0_44, %c0_45, %c38] : memref<1x4x512xbf16, #tpu.memory_space<vmem>>, vector<1x4x384xbf16>
    %50 = vector.shape_cast %49 : vector<1x4x384xbf16> to vector<4x384xbf16>
    %cst_46 = arith.constant dense<0.000000e+00> : vector<8x384xf32>
    %51 = tpu.matmul %48, %50, %cst_46 {dimension_numbers = #tpu.dot_dimension_numbers<[1], [0], [0], [1], [0, 0, 1, 1], [], []>} : vector<8x4xbf16>, vector<4x384xbf16>, vector<8x384xf32> -> vector<8x384xf32>
    %52 = arith.addf %46, %51 : vector<8x384xf32>
    %c0_47 = arith.constant 0 : index
    %c0_48 = arith.constant 0 : index
    %53 = vector.load %arg6[%c0_47, %c0_48] : memref<1x384xf32, #tpu.memory_space<vmem>>, vector<1x384xf32>
    %54 = vector.broadcast %53 : vector<1x384xf32> to vector<8x384xf32>
    %55 = arith.mulf %52, %54 : vector<8x384xf32>
    %cst_49 = arith.constant dense<0.000000e+00> : vector<8xf32>
    %56 = vector.multi_reduction <add>, %55, %cst_49 [1] : vector<8x384xf32> to vector<8xf32>
    %57 = vector.shape_cast %56 : vector<8xf32> to vector<8x1xf32>
    %58 = arith.mulf %55, %52 : vector<8x384xf32>
    %cst_50 = arith.constant dense<0.000000e+00> : vector<8xf32>
    %59 = vector.multi_reduction <add>, %58, %cst_50 [1] : vector<8x384xf32> to vector<8xf32>
    %60 = vector.shape_cast %59 : vector<8xf32> to vector<8x1xf32>
    %cst_51 = arith.constant 3.906250e-03 : f32
    %61 = vector.broadcast %cst_51 : f32 to vector<8x1xf32>
    %62 = arith.mulf %57, %61 : vector<8x1xf32>
    %cst_52 = arith.constant 3.906250e-03 : f32
    %63 = vector.broadcast %cst_52 : f32 to vector<8x1xf32>
    %64 = arith.mulf %60, %63 : vector<8x1xf32>
    %65 = arith.mulf %62, %62 : vector<8x1xf32>
    %66 = arith.subf %64, %65 : vector<8x1xf32>
    %cst_53 = arith.constant 0.000000e+00 : f32
    %67 = vector.broadcast %cst_53 : f32 to vector<8x1xf32>
    %68 = arith.maximumf %66, %67 : vector<8x1xf32>
    %cst_54 = arith.constant 9.99999974E-6 : f32
    %69 = vector.broadcast %cst_54 : f32 to vector<8x1xf32>
    %70 = arith.addf %68, %69 : vector<8x1xf32>
    %71 = math.rsqrt %70 : vector<8x1xf32>
    %c0_55 = arith.constant 0 : index
    %c0_56 = arith.constant 0 : index
    %72 = vector.load %arg4[%c0_55, %c0_56] : memref<8x1xf32, #tpu.memory_space<vmem>>, vector<8x1xf32>
    %73 = arith.mulf %71, %72 : vector<8x1xf32>
    %c0_57 = arith.constant 0 : index
    %c0_58 = arith.constant 0 : index
    %74 = vector.load %arg5[%c0_57, %c0_58] : memref<8x1xf32, #tpu.memory_space<vmem>>, vector<8x1xf32>
    %75 = arith.mulf %62, %73 : vector<8x1xf32>
    %76 = arith.subf %74, %75 : vector<8x1xf32>
    %77 = vector.broadcast %73 : vector<8x1xf32> to vector<8x384xf32>
    %78 = arith.mulf %52, %77 : vector<8x384xf32>
    %79 = vector.broadcast %76 : vector<8x1xf32> to vector<8x384xf32>
    %80 = arith.addf %78, %79 : vector<8x384xf32>
    %cst_59 = arith.constant 0.00999999977 : f32
    %81 = vector.broadcast %cst_59 : f32 to vector<8x384xf32>
    %82 = arith.mulf %81, %80 : vector<8x384xf32>
    %83 = arith.maximumf %80, %82 : vector<8x384xf32>
    %c0_60 = arith.constant 0 : index
    %c0_61 = arith.constant 0 : index
    %c0_62 = arith.constant 0 : index
    %84 = vector.load %arg7[%c0_60, %c0_61, %c0_62] : memref<1x8x384xf32, #tpu.memory_space<vmem>>, vector<1x8x384xf32>
    %85 = vector.shape_cast %84 : vector<1x8x384xf32> to vector<8x384xf32>
    %86 = vector.shape_cast %83 : vector<8x384xf32> to vector<1x8x384xf32>
    tpu.vector_store %arg7[%c0_60, %c0_61, %c0_62], %86 {strides = array<i32>} : memref<1x8x384xf32, #tpu.memory_space<vmem>>, vector<1x8x384xf32>,
    return
  }
  func.func @transform_0(%arg0: i32, %arg1: i32) -> (i32, i32, i32) {
    %c0_i32 = arith.constant 0 : i32
    %c0_i32_0 = arith.constant 0 : i32
    %c0_i32_1 = arith.constant 0 : i32
    return %arg0, %c0_i32, %c0_i32_0 : i32, i32, i32
  }
  func.func @transform_1(%arg0: i32, %arg1: i32) -> (i32, i32, i32) {
    %c0_i32 = arith.constant 0 : i32
    %c0_i32_0 = arith.constant 0 : i32
    %c0_i32_1 = arith.constant 0 : i32
    return %c0_i32, %arg1, %c0_i32_0 : i32, i32, i32
  }
  func.func @transform_2(%arg0: i32, %arg1: i32) -> (i32, i32) {
    %c0_i32 = arith.constant 0 : i32
    %c0_i32_0 = arith.constant 0 : i32
    return %arg1, %c0_i32 : i32, i32
  }
  func.func @transform_3(%arg0: i32, %arg1: i32) -> (i32, i32) {
    %c0_i32 = arith.constant 0 : i32
    %c0_i32_0 = arith.constant 0 : i32
    return %arg1, %c0_i32 : i32, i32
  }
  func.func @transform_4(%arg0: i32, %arg1: i32) -> (i32, i32) {
    %c0_i32 = arith.constant 0 : i32
    %c0_i32_0 = arith.constant 0 : i32
    %c0_i32_1 = arith.constant 0 : i32
    return %c0_i32, %c0_i32_0 : i32, i32
  }
  func.func @transform_5(%arg0: i32, %arg1: i32) -> (i32, i32, i32) {
    %c0_i32 = arith.constant 0 : i32
    %c0_i32_0 = arith.constant 0 : i32
    return %arg0, %arg1, %c0_i32 : i32, i32, i32
  }
}

</mosaic_0001>

<bundles_post_ra>
// kernel: tpu_custom_call.1
= control target key start
LH: loop header
LB: loop body
LE: loop exit
PB: predicated region body
PF: predicated region fallthrough
CT: control target
= control target key end

     0   :  { %10 = vsyncpa [#allocation3], 0  ;;  %s1636_s0 = inlined_call_operand.vmem [shape: bf16[2,4,512], index: 0, kind: input, shape index: {}]   ;;  %s1637_s1 = inlined_call_operand.vmem [shape: bf16[9,8,4], index: 1, kind: input, shape index: {}]   ;;  %s1638_s2 = inlined_call_operand.vmem [shape: f32[8,1], index: 2, kind: input, shape index: {}]   ;;  %s1639_s3 = inlined_call_operand.vmem [shape: f32[8,1], index: 3, kind: input, shape index: {}]   ;;  %s1640_s4 = inlined_call_operand.vmem [shape: f32[1,384], index: 4, kind: input, shape index: {}]   ;;  %s1641_s5 = inlined_call_operand.hbm [shape: f32[2,8,384], index: 5, kind: output, shape index: {}]  }
   0x1   :  { %12 = vsyncpa [#allocation3 + $0x1], 0  ;;  %s1415_s18 = smov 0   ;;  %s1417_s19 = smov 0  }
   0x2   :  { %s1419_s20 = smov 0   ;;  %s1421_s21 = smov 0  }
   0x3   :  { %s1423_s22 = smov 0   ;;  %s1425_s23 = smov 0  }
   0x4 LB: > { %s1177_s24 = sadd.s32 4294967295, %s1374_s23   ;;  %s1178_s25 = sadd.s32 4294967294, %s1374_s23   ;;  %s1374_s23 = sphi %s1425_s23, %s18_s23   ;;  %s1370_s22 = sphi %s1423_s22, %s1648_s22   ;;  %s1366_s21 = sphi %s1421_s21, %s1647_s21   ;;  %s1362_s20 = sphi %s1419_s20, %s1646_s20   ;;  %s1358_s19 = sphi %s1417_s19, %s1645_s19   ;;  %s1354_s18 = sphi %s1415_s18, %s1644_s18  }
   0x5   : > { %s30_s26 = sadd.s32 1, %s1370_s22  ;;  %s164_s27 = sadd.s32 1, %s1362_s20 }
   0x6   : > { %p32_p0 = scmp.ge.s32.totalorder %s30_s26, 2  ;;  %p174_p1 = scmp.ne.s32.totalorder %s1362_s20, %s1358_s19 }
   0x7   : > { %p175_p2 = scmp.eq.s32.totalorder %s1177_s24, 1  ;;  %p180_p3 = scmp.ne.s32.totalorder %s1358_s19, %s1354_s18 }
   0x8   : > { %s1650_s26 = smov (%p32_p0, %s30_s26), 0  ;;  %p181_p5 = scmp.eq.s32.totalorder %s1178_s25, 1 }
   0x9   : > { %p1455_p4 = por %p175_p2, %p174_p1  ;;  %s159_s29 = ssub.s32 %s1370_s22, %s1650_s26 }
   0xa   : > { %p1184_p6 = scmp.ge.s32.totalorder %s1374_s23, 1  ;;  %p162_p7 = scmp.eq.s32.totalorder %s159_s29, 0 }
   0xb   : > { %p1462_p8 = por %p181_p5, %p180_p3  ;;  %p231_p9 = scmp.lt.s32.totalorder %s1374_s23, 3 }
   0xc   : > { %s1468_s6 = scalar_select %p162_p7, %s1362_s20, %s164_s27  }
   0xd   : > { %p232_p10 = pnand %p1184_p6, %p231_p9 }
   0xe   : > { %p271_p11 = scmp.lt.s32.totalorder (!%p232_p10), %s1366_s21, 1  ;;  %s1376_s12 = smov (!%p232_p10), 127  }
   0xf   : > { %235 = sbr.rel (%p232_p10) target bundleno = 678 (0x2a6), region = 40  ;;  %s1377_s13 = smov (!%p232_p10), 126  }
  0x10   : > { %s1378_s14 = smov (!%p232_p10), 110   ;;  %s1379_s15 = smov (!%p232_p10), 109  }
  0x11   : > { %s1380_s16 = smov (!%p232_p10), 108   ;;  %s1381_s17 = smov (!%p232_p10), 92  }
  0x12   : > { %s1382_s24 = smov (!%p232_p10), 91   ;;  %s1383_s25 = smov (!%p232_p10), 90  }
  0x14   : > { %s272_s7 = scalar_select %p271_p11, %s1366_s21, 1  ;;  %vm320_vm0 = vcmask 1041408   ;;  %v289_v38 = vld [vmem:[%s1637_s1] sm:$0xf]  ;;  %vm316_vm1 = vcmask 31744   ;;  %vm443_vm2 = vcmask 1031168  }
  0x15   : > { %vm312_vm3 = vcmask 1039360   ;;  %v1187_v55 = vld [vmem:[%s1637_s1 + $0x4] sm:$0xf]  ;;  %vm522_vm4 = vcmask 900096   ;;  %v1194_v62 = vld [vmem:[%s1637_s1 + $0x8] sm:$0xf] }
  0x16   : > { %s1225_s8 = sshll.u32 %s272_s7, 3  ;;  %vm601_vm5 = vcmask 891904   ;;  %vm680_vm6 = vcmask 883712   ;;  %vm759_vm7 = vcmask 752640   ;;  %vm838_vm8 = vcmask 744448  }
  0x17   : > { %s275_s11 = scalar_lea.vmem %s1636_s0, %s1225_s8  ;;  %vm917_vm9 = vcmask 736256  }
  0x18   : > { %v1475_v0 = vld [vmem:[%s275_s11] sm:$0xff] }
  0x19   : > { %295 = vst [vmem:[#allocation1] ss:$4 sm:$0xff] %v1475_v0  ;;  %v290_v1 = vld [vmem:[%s275_s11] sm:$0x3f] }
  0x20   : > { %v300_v2 = vld.sshfl [vmem:[#allocation1 + $0x10] sm:$0xff pattern:$0x73625140]  ;;  %v296_v3 = vld.sshfl [vmem:[#allocation1] sm:$0xff pattern:$0x73625140] }
  0x21   : > { %308 = vrot.lane.b32.xlu0 %v300_v2, %s1376_s12  ;;  %304 = vrot.lane.b32.xlu1 %v296_v3, %s1376_s12  ;;  %v302_v4 = vld.sshfl [vmem:[#allocation1 + $0x18] sm:$0xff pattern:$0x73625140]  ;;  %v298_v5 = vld.sshfl [vmem:[#allocation1 + $0x8] sm:$0xff pattern:$0x73625140] }
  0x22   : > { %370 = vst [vmem:[#allocation1] ss:$4 sm:$0xff] %v290_v1 }
  0x29   : > { %310 = vrot.lane.b32.xlu0 %v302_v4, %s1376_s12  ;;  %306 = vrot.lane.b32.xlu1 %v298_v5, %s1376_s12  ;;  %v1478_v6 = vld.sshfl [vmem:[#allocation1] sm:$0xff pattern:$0x73625140]  ;;  %v1480_v7 = vld.sshfl [vmem:[#allocation1 + $0x8] sm:$0xff pattern:$0x73625140] }
  0x2a   : > { %v1482_v8 = vld.sshfl [vmem:[#allocation1 + $0x10] sm:$0xff pattern:$0x73625140]  ;;  %v377_v35 = vsel %vm320_vm0, %v1478_v6, 0  ;;  %v379_v46 = vsel %vm320_vm0, %v1480_v7, 0  ;;  %s1316_s12 = scalar_lea.hbm %s1641_s5, 48 }
  0x2b   : > { %426 = vst [vmem:[#allocation1] ss:$4 sm:$0xff] %v1475_v0  ;;  %390 = vmatpush.bf16.msra.mxu3 %v377_v35  ;;  %v381_v50 = vsel %vm320_vm0, %v1482_v8, 0 }
  0x2e   : > { %1191 = vmatmul.msk.bf16.vlgmr.msra.gmra.mxu3 %vm316_vm1, %v289_v38 }
  0x32   : > { %v429_v9 = vld.sshfl [vmem:[#allocation1 + $0x8] sm:$0xff pattern:$0x73625140]  ;;  %v431_v10 = vld.sshfl [vmem:[#allocation1 + $0x10] sm:$0xff pattern:$0x73625140] }
  0x33   : > { %439 = vrot.lane.b32.xlu0 %v431_v10, %s1377_s13  ;;  %v427_v11 = vld.sshfl [vmem:[#allocation1] sm:$0xff pattern:$0x73625140]  ;;  %v433_v12 = vld.sshfl [vmem:[#allocation1 + $0x18] sm:$0xff pattern:$0x73625140] }
  0x34   : > { %435 = vrot.lane.b32.xlu2 %v427_v11, %s1377_s13  ;;  %505 = vst [vmem:[#allocation1] ss:$4 sm:$0xff] %v1475_v0 }
  0x3b   : > { %441 = vrot.lane.b32.xlu0 %v433_v12, %s1377_s13  ;;  %v508_v13 = vld.sshfl [vmem:[#allocation1 + $0x8] sm:$0xff pattern:$0x73625140]  ;;  %v510_v14 = vld.sshfl [vmem:[#allocation1 + $0x10] sm:$0xff pattern:$0x73625140] }
  0x3c   : > { %v512_v15 = vld.sshfl [vmem:[#allocation1 + $0x18] sm:$0xff pattern:$0x73625140]  ;;  %516 = vrot.lane.b32.xlu1 %v508_v13, %s1378_s14  ;;  %437 = vrot.lane.b32.xlu2 %v429_v9, %s1377_s13  ;;  %v506_v16 = vld.sshfl [vmem:[#allocation1] sm:$0xff pattern:$0x73625140] }
  0x3d   : > { %584 = vst [vmem:[#allocation1] ss:$4 sm:$0xff] %v1475_v0  ;;  %v1198_v12 = vld [vmem:[%s1637_s1 + $0xc] sm:$0xf] }
  0x44   : > { %514 = vrot.lane.b32.xlu1 %v506_v16, %s1378_s14  ;;  %v589_v17 = vld.sshfl [vmem:[#allocation1 + $0x10] sm:$0xff pattern:$0x73625140]  ;;  %v585_v18 = vld.sshfl [vmem:[#allocation1] sm:$0xff pattern:$0x73625140]  ;;  %518 = vrot.lane.b32.xlu2 %v510_v14, %s1378_s14 }
  0x45   : > { %597 = vrot.lane.b32.xlu0 %v589_v17, %s1379_s15  ;;  %v591_v19 = vld.sshfl [vmem:[#allocation1 + $0x18] sm:$0xff pattern:$0x73625140]  ;;  %v587_v20 = vld.sshfl [vmem:[#allocation1 + $0x8] sm:$0xff pattern:$0x73625140] }
  0x46   : > { %663 = vst [vmem:[#allocation1] ss:$4 sm:$0xff] %v1475_v0 }
  0x4c   : > { %599 = vrot.lane.b32.xlu1 %v591_v19, %s1379_s15  ;;  %520 = vrot.lane.b32.xlu2 %v512_v15, %s1378_s14  ;;  %s268_s14 = sand.u32 1, %s1358_s19  }
  0x4d   : > { %595 = vrot.lane.b32.xlu0 %v587_v20, %s1379_s15  ;;  %v666_v21 = vld.sshfl [vmem:[#allocation1 + $0x8] sm:$0xff pattern:$0x73625140]  ;;  %v668_v22 = vld.sshfl [vmem:[#allocation1 + $0x10] sm:$0xff pattern:$0x73625140] }
  0x4e   : > { %v670_v23 = vld.sshfl [vmem:[#allocation1 + $0x18] sm:$0xff pattern:$0x73625140]  ;;  %v664_v24 = vld.sshfl [vmem:[#allocation1] sm:$0xff pattern:$0x73625140] }
  0x4f   : > { %742 = vst [vmem:[#allocation1] ss:$4 sm:$0xff] %v1475_v0 }
  0x54   : > { %672 = vrot.lane.b32.xlu1 %v664_v24, %s1380_s16  ;;  %593 = vrot.lane.b32.xlu2 %v585_v18, %s1379_s15  ;;  %s1226_s15 = smul.u32 24, %s268_s14 }
  0x56   : > { %v749_v25 = vld.sshfl [vmem:[#allocation1 + $0x18] sm:$0xff pattern:$0x73625140]  ;;  %v743_v26 = vld.sshfl [vmem:[#allocation1] sm:$0xff pattern:$0x73625140] }
  0x57   : > { %751 = vrot.lane.b32.xlu0 %v743_v26, %s1381_s17  ;;  %v745_v27 = vld.sshfl [vmem:[#allocation1 + $0x8] sm:$0xff pattern:$0x73625140]  ;;  %v747_v28 = vld.sshfl [vmem:[#allocation1 + $0x10] sm:$0xff pattern:$0x73625140] }
  0x58   : > { %821 = vst [vmem:[#allocation1] ss:$4 sm:$0xff] %v1475_v0  ;;  %s270_s27 = scalar_lea.vmem [#allocation2], %s1226_s15 }
  0x59   : > { %s1059_s29 = sshll.u32 %s270_s27, 4  ;;  %s1060_s29 = int_to_ptr.vmem [resolvable:$true] %s1059_s29 }
  0x5c   : > { %753 = vrot.lane.b32.xlu1 %v745_v27, %s1381_s17  ;;  %674 = vrot.lane.b32.xlu2 %v666_v21, %s1380_s16 }
  0x5f   : > { %678 = vrot.lane.b32.xlu0 %v670_v23, %s1380_s16  ;;  %v822_v29 = vld.sshfl [vmem:[#allocation1] sm:$0xff pattern:$0x73625140]  ;;  %v824_v30 = vld.sshfl [vmem:[#allocation1 + $0x8] sm:$0xff pattern:$0x73625140] }
  0x60   : > { %v826_v31 = vld.sshfl [vmem:[#allocation1 + $0x10] sm:$0xff pattern:$0x73625140]  ;;  %v828_v32 = vld.sshfl [vmem:[#allocation1 + $0x18] sm:$0xff pattern:$0x73625140] }
  0x61   : > { %900 = vst [vmem:[#allocation1] ss:$4 sm:$0xff] %v1475_v0 }
  0x64   : > { %755 = vrot.lane.b32.xlu1 %v747_v28, %s1381_s17  ;;  %676 = vrot.lane.b32.xlu2 %v668_v22, %s1380_s16  ;;  %s1227_s16 = smul.u32 24, %s1366_s21  ;;  %s1044_s21 = scalar_lea.sflag [#allocation3], %s268_s14 }
  0x67   : > { %834 = vrot.lane.b32.xlu0 %v826_v31, %s1382_s24  ;;  %v1202_v31 = vld [vmem:[%s1637_s1 + $0x10] sm:$0xf] }
  0x68   : > { %v905_v33 = vld.sshfl [vmem:[#allocation1 + $0x10] sm:$0xff pattern:$0x73625140]  ;;  %v901_v34 = vld.sshfl [vmem:[#allocation1] sm:$0xff pattern:$0x73625140] }
  0x69   : > { %v903_v36 = vld.sshfl [vmem:[#allocation1 + $0x8] sm:$0xff pattern:$0x73625140]  ;;  %v907_v37 = vld.sshfl [vmem:[#allocation1 + $0x18] sm:$0xff pattern:$0x73625140] }
  0x6c   : > { %757 = vrot.lane.b32.xlu1 %v749_v25, %s1381_s17  ;;  %832 = vrot.lane.b32.xlu2 %v824_v30, %s1382_s24 }
  0x6f   : > { %836 = vrot.lane.b32.xlu0 %v828_v32, %s1382_s24 }
  0x74   : > { %913 = vrot.lane.b32.xlu1 %v905_v33, %s1383_s25  ;;  %830 = vrot.lane.b32.xlu2 %v822_v29, %s1382_s24  ;;  %v1206_v29 = vld [vmem:[%s1637_s1 + $0x14] sm:$0xf] }
  0x77   : > { %909 = vrot.lane.b32.xlu0 %v901_v34, %s1383_s25 }
  0x7c   : > { %911 = vrot.lane.b32.xlu1 %v903_v36, %s1383_s25  ;;  %915 = vrot.lane.b32.xlu2 %v907_v37, %s1383_s25  ;;  %s1057_s25 = scalar_lea.hbm %s1641_s5, %s1227_s16 }
  0x7d   : > { %s1061_s7 = sshll.u32 %s1057_s25, 4  ;;  %s1062_s7 = int_to_ptr.hbm [resolvable:$true] %s1061_s7 }
  0x7e   : > { %s1310_s8 = sshra.s32 %s1062_s7, 4  ;;  %s1311_s8 = int_to_ptr.hbm [resolvable:$true] %s1310_s8 }
  0x7f   : > { %s1312_s9 = scalar_lea.hbm %s1311_s8, 24  ;;  %p1317_p1 = scmp.lt.s32.totalorder %s1311_s8, %s1641_s5 }
  0x80   : > { %p1313_p12 = scmp.ne.s32.totalorder %s1311_s8, %s1312_s9  ;;  %p1318_p2 = scmp.lt.s32.totalorder %s1316_s12, %s1312_s9 }
  0x82   : > { %p1314_p13 = pnand %p1313_p12, %p1455_p4  ;;  %p1319_p3 = por %p1318_p2, %p1317_p1 }
  0x84   : > { %p1315_p0 = pneg %p1314_p13 }
  0x86   : > { %p1320_p5 = pnand %p1319_p3, %p1315_p0 }
  0x8e   : > { %v436_v39 = vpop.permute.xlu2 %435 }
  0x93   : > { %v309_v40 = vpop.permute.xlu0 %308  ;;  %v305_v41 = vpop.permute.xlu1 %304 }
  0x96   : > { %v438_v42 = vpop.permute.xlu2 %437 }
  0x97   : > { %v444_v43 = vsel %vm443_vm2, %v436_v39, %v438_v42 }
  0x98   : > { %v451_v54 = vsel %vm320_vm0, %v444_v43, 0 }
  0x9b   : > { %v311_v44 = vpop.permute.xlu0 %310  ;;  %v307_v45 = vpop.permute.xlu1 %306 }
  0x9c   : > { %v313_v47 = vsel %vm312_vm3, %v305_v41, %v307_v45  ;;  %v314_v48 = vsel %vm312_vm3, %v307_v45, %v309_v40  ;;  %v315_v49 = vsel %vm312_vm3, %v309_v40, %v311_v44  ;;  %v1210_v44 = vld [vmem:[%s1637_s1 + $0x18] sm:$0xf] }
  0x9d   : > { %v322_v51 = vsel %vm320_vm0, %v313_v47, 0  ;;  %v325_v52 = vsel %vm320_vm0, %v314_v48, 0  ;;  %v328_v53 = vsel %vm320_vm0, %v315_v49, 0 }
  0x9e   : > { %337 = vmatpush.bf16.msra.mxu0 %v322_v51  ;;  %350 = vmatpush.bf16.msra.mxu1 %v325_v52  ;;  %v519_v56 = vpop.permute.xlu2 %518 }
  0x9f   : > { %363 = vmatpush.bf16.msra.mxu2 %v328_v53 }
  0xa1   : > { %1188 = vmatmul.msk.bf16.vlgmr.msra.gmra.mxu0 %vm316_vm1, %v1187_v55  ;;  %1189 = vmatmul.msk.bf16.vlgmr.msra.gmra.mxu1 %vm316_vm1, %v1187_v55 }
  0xa2   : > { %403 = vmatpush.bf16.msrb.mxu0 %v379_v46  ;;  %416 = vmatpush.bf16.msrb.mxu1 %v381_v50 }
  0xa3   : > { %466 = vmatpush.bf16.msrb.mxu2 %v451_v54 }
  0xa4   : > { %1190 = vmatmul.msk.bf16.vlgmr.msra.gmra.mxu2 %vm316_vm1, %v1187_v55 }
  0xa5   : > { %v440_v57 = vpop.permute.xlu0 %439 }
  0xa6   : > { %v445_v58 = vsel %vm443_vm2, %v438_v42, %v440_v57  ;;  %v521_v59 = vpop.permute.xlu2 %520 }
  0xa7   : > { %v454_v60 = vsel %vm320_vm0, %v445_v58, 0  ;;  %v525_v61 = vsel %vm522_vm4, %v519_v56, %v521_v59 }
  0xa8   : > { %479 = vmatpush.bf16.msrb.mxu3 %v454_v60  ;;  %v536_v63 = vsel %vm320_vm0, %v525_v61, 0 }
  0xab   : > { %1196 = vmatmul.msk.bf16.vlgmr.msrb.gmra.mxu3 %vm316_vm1, %v1194_v62 }
  0xac   : > { %571 = vmatpush.bf16.msra.mxu3 %v536_v63 }
  0xad   : > { %v442_v0 = vpop.permute.xlu0 %441 }
  0xae   : > { %v446_v1 = vsel %vm443_vm2, %v440_v57, %v442_v0  ;;  %v517_v2 = vpop.permute.xlu1 %516  ;;  %v594_v3 = vpop.permute.xlu2 %593  ;;  %v1214_v57 = vld [vmem:[%s1637_s1 + $0x1c] sm:$0xf]  ;;  %v1218_v0 = vld [vmem:[%s1637_s1 + $0x20] sm:$0xf] }
  0xaf   : > { %v457_v4 = vsel %vm320_vm0, %v446_v1, 0  ;;  %v524_v5 = vsel %vm522_vm4, %v517_v2, %v519_v56 }
  0xb0   : > { %v533_v6 = vsel %vm320_vm0, %v524_v5, 0  ;;  %492 = vmatpush.bf16.msra.mxu0 %v457_v4 }
  0xb1   : > { %558 = vmatpush.bf16.msra.mxu2 %v533_v6  ;;  %1192 = vmatmul.msk.bf16.vlgmr.msrb.gmra.mxu0 %vm316_vm1, %v289_v38  ;;  %v392_v1 = vpop.f32.mrf.mxu3 }
  0xb2   : > { %1193 = vmatmul.msk.bf16.vlgmr.msrb.gmra.mxu1 %vm316_vm1, %v289_v38 }
  0xb4   : > { %1195 = vmatmul.msk.bf16.vlgmr.msrb.gmra.mxu2 %vm316_vm1, %v1194_v62 }
  0xb6   : > { %v515_v7 = vpop.permute.xlu1 %514  ;;  %v675_v8 = vpop.permute.xlu2 %674 }
  0xb7   : > { %v523_v9 = vsel %vm522_vm4, %v515_v7, %v517_v2  ;;  %v598_v10 = vpop.permute.xlu0 %597 }
  0xb8   : > { %v530_v11 = vsel %vm320_vm0, %v523_v9, 0 }
  0xb9   : > { %545 = vmatpush.bf16.msra.mxu1 %v530_v11  ;;  %v394_v2 = vpop.f32.mrf.mxu3 }
  0xbb   : > { %1201 = vmatmul.msk.bf16.vlgmr.msra.gmra.mxu3 %vm316_vm1, %v1198_v12 }
  0xbe   : > { %v600_v13 = vpop.permute.xlu1 %599  ;;  %v677_v14 = vpop.permute.xlu2 %676 }
  0xbf   : > { %v604_v15 = vsel %vm601_vm5, %v598_v10, %v600_v13  ;;  %v596_v16 = vpop.permute.xlu0 %595  ;;  %v682_v17 = vsel %vm680_vm6, %v675_v8, %v677_v14 }
  0xc0   : > { %v615_v18 = vsel %vm320_vm0, %v604_v15, 0  ;;  %v603_v19 = vsel %vm601_vm5, %v596_v16, %v598_v10  ;;  %v602_v20 = vsel %vm601_vm5, %v594_v3, %v596_v16  ;;  %v691_v23 = vsel %vm320_vm0, %v682_v17, 0 }
  0xc1   : > { %v612_v21 = vsel %vm320_vm0, %v603_v19, 0  ;;  %v609_v22 = vsel %vm320_vm0, %v602_v20, 0  ;;  %650 = vmatpush.bf16.msrb.mxu2 %v615_v18  ;;  %1197 = vmatmul.msk.bf16.vlgmr.msra.gmra.mxu0 %vm316_vm1, %v1194_v62 }
  0xc2   : > { %637 = vmatpush.bf16.msrb.mxu1 %v612_v21  ;;  %624 = vmatpush.bf16.msrb.mxu0 %v609_v22 }
  0xc3   : > { %1199 = vmatmul.msk.bf16.vlgmr.msra.gmra.mxu1 %vm316_vm1, %v1198_v12 }
  0xc4   : > { %1200 = vmatmul.msk.bf16.vlgmr.msra.gmra.mxu2 %vm316_vm1, %v1198_v12 }
  0xc6   : > { %716 = vmatpush.bf16.msra.mxu0 %v691_v23  ;;  %v673_v24 = vpop.permute.xlu1 %672  ;;  %v833_v25 = vpop.permute.xlu2 %832 }
  0xc7   : > { %v681_v26 = vsel %vm680_vm6, %v673_v24, %v675_v8 }
  0xc8   : > { %v688_v27 = vsel %vm320_vm0, %v681_v26, 0 }
  0xc9   : > { %v752_v28 = vpop.permute.xlu0 %751  ;;  %703 = vmatpush.bf16.msrb.mxu3 %v688_v27 }
  0xcc   : > { %1207 = vmatmul.msk.bf16.vlgmr.msrb.gmra.mxu3 %vm316_vm1, %v1206_v29 }
  0xce   : > { %v754_v30 = vpop.permute.xlu1 %753  ;;  %v831_v32 = vpop.permute.xlu2 %830 }
  0xcf   : > { %v760_v33 = vsel %vm759_vm7, %v752_v28, %v754_v30  ;;  %v839_v34 = vsel %vm838_vm8, %v831_v32, %v833_v25 }
  0xd0   : > { %v767_v35 = vsel %vm320_vm0, %v760_v33, 0  ;;  %v846_v38 = vsel %vm320_vm0, %v839_v34, 0 }
  0xd1   : > { %782 = vmatpush.bf16.msra.mxu2 %v767_v35  ;;  %v679_v36 = vpop.permute.xlu0 %678  ;;  %1203 = vmatmul.msk.bf16.vlgmr.msrb.gmra.mxu0 %vm316_vm1, %v1202_v31 }
  0xd2   : > { %v683_v37 = vsel %vm680_vm6, %v677_v14, %v679_v36 }
  0xd3   : > { %v694_v39 = vsel %vm320_vm0, %v683_v37, 0  ;;  %1204 = vmatmul.msk.bf16.vlgmr.msrb.gmra.mxu1 %vm316_vm1, %v1202_v31 }
  0xd4   : > { %1205 = vmatmul.msk.bf16.vlgmr.msrb.gmra.mxu2 %vm316_vm1, %v1202_v31  ;;  %729 = vmatpush.bf16.msra.mxu1 %v694_v39 }
  0xd6   : > { %v756_v40 = vpop.permute.xlu1 %755  ;;  %v916_v53 = vpop.permute.xlu2 %915 }
  0xd7   : > { %v761_v41 = vsel %vm759_vm7, %v754_v30, %v756_v40 }
  0xd8   : > { %861 = vmatpush.bf16.msrb.mxu1 %v846_v38  ;;  %v770_v42 = vsel %vm320_vm0, %v761_v41, 0 }
  0xd9   : > { %795 = vmatpush.bf16.msra.mxu3 %v770_v42  ;;  %v835_v43 = vpop.permute.xlu0 %834 }
  0xda   : > { %v840_v45 = vsel %vm838_vm8, %v833_v25, %v835_v43 }
  0xdb   : > { %v849_v46 = vsel %vm320_vm0, %v840_v45, 0 }
  0xdc   : > { %1212 = vmatmul.msk.bf16.vlgmr.msra.gmra.mxu3 %vm316_vm1, %v1210_v44  ;;  %874 = vmatpush.bf16.msrb.mxu2 %v849_v46 }
  0xde   : > { %v758_v47 = vpop.permute.xlu1 %757 }
  0xdf   : > { %v762_v48 = vsel %vm759_vm7, %v756_v40, %v758_v47 }
  0xe0   : > { %v773_v49 = vsel %vm320_vm0, %v762_v48, 0 }
  0xe1   : > { %808 = vmatpush.bf16.msrb.mxu0 %v773_v49  ;;  %v837_v50 = vpop.permute.xlu0 %836 }
  0xe2   : > { %v841_v51 = vsel %vm838_vm8, %v835_v43, %v837_v50  ;;  %1208 = vmatmul.msk.bf16.vlgmr.msra.gmra.mxu0 %vm316_vm1, %v1206_v29 }
  0xe3   : > { %v852_v52 = vsel %vm320_vm0, %v841_v51, 0  ;;  %1209 = vmatmul.msk.bf16.vlgmr.msra.gmra.mxu1 %vm316_vm1, %v1206_v29 }
  0xe4   : > { %1211 = vmatmul.msk.bf16.vlgmr.msra.gmra.mxu2 %vm316_vm1, %v1210_v44  ;;  %887 = vmatpush.bf16.msrb.mxu3 %v852_v52 }
  0xe6   : > { %v914_v54 = vpop.permute.xlu1 %913 }
  0xe7   : > { %v920_v55 = vsel %vm917_vm9, %v914_v54, %v916_v53 }
  0xe8   : > { %v931_v56 = vsel %vm320_vm0, %v920_v55, 0 }
  0xe9   : > { %966 = vmatpush.bf16.msra.mxu2 %v931_v56  ;;  %v910_v58 = vpop.permute.xlu0 %909 }
  0xec   : > { %1217 = vmatmul.msk.bf16.vlgmr.msrb.gmra.mxu3 %vm316_vm1, %v1214_v57 }
  0xee   : > { %v912_v59 = vpop.permute.xlu1 %911 }
  0xef   : > { %v919_v60 = vsel %vm917_vm9, %v912_v59, %v914_v54  ;;  %v918_v61 = vsel %vm917_vm9, %v910_v58, %v912_v59 }
  0xf0   : > { %v928_v62 = vsel %vm320_vm0, %v919_v60, 0  ;;  %v925_v63 = vsel %vm320_vm0, %v918_v61, 0  ;;  %v975_v61 = vld [vmem:[%s1640_s4] sm:$0x7] }
  0xf1   : > { %953 = vmatpush.bf16.msra.mxu1 %v928_v62  ;;  %940 = vmatpush.bf16.msra.mxu0 %v925_v63 }
  0xf2   : > { %1213 = vmatmul.msk.bf16.vlgmr.msrb.gmra.mxu0 %vm316_vm1, %v1210_v44 }
  0xf3   : > { %1215 = vmatmul.msk.bf16.vlgmr.msrb.gmra.mxu1 %vm316_vm1, %v1214_v57 }
  0xf4   : > { %1216 = vmatmul.msk.bf16.vlgmr.msrb.gmra.mxu2 %vm316_vm1, %v1214_v57 }
 0x102   : > { %1219 = vmatmul.msk.bf16.vlgmr.msra.gmra.mxu0 %vm316_vm1, %v1218_v0 }
 0x103   : > { %1220 = vmatmul.msk.bf16.vlgmr.msra.gmra.mxu1 %vm316_vm1, %v1218_v0 }
 0x104   : > { %1221 = vmatmul.msk.bf16.vlgmr.msra.gmra.mxu2 %vm316_vm1, %v1218_v0 }
 0x11e   : > { %v339_v3 = vpop.f32.mrf.mxu0  ;;  %v352_v4 = vpop.f32.mrf.mxu1 }
 0x11f   : > { %v393_v5 = vadd.f32 %v392_v1, %v339_v3 }
 0x126   : > { %v341_v7 = vpop.f32.mrf.mxu0  ;;  %v354_v8 = vpop.f32.mrf.mxu1 }
 0x127   : > { %v365_v6 = vpop.f32.mrf.mxu2  ;;  %v978_v7 = vperm.slane %v975_v61, 1 }
 0x12e   : > { %v405_v10 = vpop.f32.mrf.mxu0  ;;  %v481_v11 = vpop.f32.mrf.mxu3 }
 0x12f   : > { %v367_v9 = vpop.f32.mrf.mxu2  ;;  %v406_v12 = vadd.f32 %v405_v10, %v352_v4  ;;  %v418_v13 = vpop.f32.mrf.mxu1  ;;  %v977_v4 = vperm.slane %v975_v61, 0 }
 0x130   : > { %v419_v14 = vadd.f32 %v418_v13, %v365_v6 }
 0x131   : > { %v499_v15 = vadd.f32 %v481_v11, %v406_v12 }
 0x136   : > { %v407_v18 = vpop.f32.mrf.mxu0  ;;  %v483_v19 = vpop.f32.mrf.mxu3 }
 0x137   : > { %v468_v16 = vpop.f32.mrf.mxu2  ;;  %v420_v20 = vpop.f32.mrf.mxu1 }
 0x138   : > { %v498_v17 = vadd.f32 %v468_v16, %v393_v5 }
 0x13e   : > { %v494_v22 = vpop.f32.mrf.mxu0  ;;  %v573_v23 = vpop.f32.mrf.mxu3 }
 0x13f   : > { %v470_v21 = vpop.f32.mrf.mxu2  ;;  %v500_v52 = vadd.f32 %v494_v22, %v419_v14 }
 0x140   : > { %v547_v24 = vpop.f32.mrf.mxu1 }
 0x141   : > { %v577_v49 = vadd.f32 %v547_v24, %v498_v17  ;;  %v579_v59 = vadd.f32 %v573_v23, %v500_v52 }
 0x146   : > { %v496_v26 = vpop.f32.mrf.mxu0  ;;  %v575_v27 = vpop.f32.mrf.mxu3 }
 0x147   : > { %v560_v25 = vpop.f32.mrf.mxu2 }
 0x148   : > { %v549_v28 = vpop.f32.mrf.mxu1  ;;  %v578_v50 = vadd.f32 %v560_v25, %v499_v15  ;;  %v979_v15 = vperm.slane %v975_v61, 2 }
 0x14e   : > { %v626_v30 = vpop.f32.mrf.mxu0 }
 0x14f   : > { %v562_v29 = vpop.f32.mrf.mxu2  ;;  %v705_v31 = vpop.f32.mrf.mxu3  ;;  %v656_v53 = vadd.f32 %v626_v30, %v577_v49 }
 0x150   : > { %v639_v32 = vpop.f32.mrf.mxu1  ;;  %v1384_v29 = vmov 0  }
 0x151   : > { %v657_v54 = vadd.f32 %v639_v32, %v578_v50  ;;  %v735_v60 = vadd.f32 %v705_v31, %v656_v53  ;;  %1292 = vset.pattern.permute.xlu1 %v1384_v29  ;;  %1293 = vset.pattern.permute.xlu0 %v1384_v29 }
 0x156   : > { %v628_v34 = vpop.f32.mrf.mxu0 }
 0x157   : > { %v652_v33 = vpop.f32.mrf.mxu2  ;;  %v707_v35 = vpop.f32.mrf.mxu3 }
 0x158   : > { %v641_v36 = vpop.f32.mrf.mxu1  ;;  %v658_v62 = vadd.f32 %v652_v33, %v579_v59 }
 0x15f   : > { %v654_v37 = vpop.f32.mrf.mxu2  ;;  %v718_v38 = vpop.f32.mrf.mxu0 }
 0x160   : > { %v797_v39 = vpop.f32.mrf.mxu3  ;;  %v731_v40 = vpop.f32.mrf.mxu1  ;;  %v736_v58 = vadd.f32 %v718_v38, %v657_v54 }
 0x161   : > { %v737_v2 = vadd.f32 %v731_v40, %v658_v62 }
 0x162   : > { %v815_v0 = vadd.f32 %v797_v39, %v736_v58 }
 0x167   : > { %v784_v41 = vpop.f32.mrf.mxu2  ;;  %v720_v42 = vpop.f32.mrf.mxu0 }
 0x168   : > { %v799_v43 = vpop.f32.mrf.mxu3  ;;  %v733_v44 = vpop.f32.mrf.mxu1  ;;  %v814_v63 = vadd.f32 %v784_v41, %v735_v60 }
 0x169   : > { %v1013_v44 = vld [vmem:[%s1638_s2] sm:$0xff] }
 0x16f   : > { %v786_v45 = vpop.f32.mrf.mxu2  ;;  %v810_v46 = vpop.f32.mrf.mxu0 }
 0x170   : > { %v889_v47 = vpop.f32.mrf.mxu3  ;;  %v863_v48 = vpop.f32.mrf.mxu1  ;;  %v816_v8 = vadd.f32 %v810_v46, %v737_v2 }
 0x171   : > { %v893_v3 = vadd.f32 %v863_v48, %v814_v63  ;;  %v1015_v48 = vld [vmem:[%s1639_s3] sm:$0xff] }
 0x172   : > { %v895_v14 = vadd.f32 %v889_v47, %v816_v8 }
 0x177   : > { %v876_v51 = vpop.f32.mrf.mxu2  ;;  %v812_v55 = vpop.f32.mrf.mxu0 }
 0x178   : > { %v891_v56 = vpop.f32.mrf.mxu3  ;;  %v865_v57 = vpop.f32.mrf.mxu1  ;;  %v894_v5 = vadd.f32 %v876_v51, %v815_v0 }
 0x17f   : > { %v878_v1 = vpop.f32.mrf.mxu2  ;;  %v942_v6 = vpop.f32.mrf.mxu0 }
 0x180   : > { %v972_v9 = vadd.f32 %v942_v6, %v893_v3  ;;  %v955_v10 = vpop.f32.mrf.mxu1 }
 0x181   : > { %v973_v11 = vadd.f32 %v955_v10, %v894_v5 }
 0x182   : > { %v983_v12 = vmul.f32 %v977_v4, %v972_v9 }
 0x183   : > { %v984_v13 = vmul.f32 %v978_v7, %v973_v11 }
 0x184   : > { %v990_v17 = vmul.f32 %v983_v12, %v972_v9 }
 0x185   : > { %v991_v18 = vmul.f32 %v984_v13, %v973_v11  ;;  %v986_v23 = vadd.f32 %v984_v13, %v983_v12 }
 0x187   : > { %v968_v16 = vpop.f32.mrf.mxu2  ;;  %v944_v20 = vpop.f32.mrf.mxu0  ;;  %v993_v26 = vadd.f32 %v991_v18, %v990_v17 }
 0x188   : > { %v974_v19 = vadd.f32 %v968_v16, %v895_v14  ;;  %v957_v21 = vpop.f32.mrf.mxu1 }
 0x18a   : > { %v985_v22 = vmul.f32 %v979_v15, %v974_v19 }
 0x18c   : > { %v987_v24 = vadd.f32 %v986_v23, %v985_v22  ;;  %v992_v25 = vmul.f32 %v985_v22, %v974_v19 }
 0x18e   : > { %988 = vadd.xlane.f32.xlu2 %v987_v24  ;;  %v994_v27 = vadd.f32 %v993_v26, %v992_v25 }
 0x18f   : > { %v970_v28 = vpop.f32.mrf.mxu2 }
 0x190   : > { %995 = vadd.xlane.f32.xlu0 %v994_v27 }
 0x201   : > { %v989_v30 = vpop.xlane.xlu2 %988 }
 0x202   : > { %v997_v31 = vmul.f32 0.00390625, %v989_v30 }
 0x203   : > { %v996_v32 = vpop.xlane.xlu0 %995 }
 0x204   : > { %v999_v33 = vmul.f32 %v997_v31, %v997_v31  ;;  %v998_v34 = vmul.f32 0.00390625, %v996_v32 }
 0x206   : > { %v1000_v35 = vsub.f32 %v998_v34, %v999_v33 }
 0x208   : > { %v1001_v36 = vmax.f32 %v1000_v35, 0.0 }
 0x20a   : > { %v1002_v37 = vadd.f32 1e-05, %v1001_v36 }
 0x20c   : > { %1294 = vrsqrt.f32 %v1002_v37  ;;  %vm1009_vm11 = vweird.f32 %v1002_v37 }
 0x212   : > { %v1295_v38 = vpop.eup %1294 }
 0x213   : > { %v1004_v39 = vmul.f32 %v1295_v38, %v1002_v37  ;;  %vm1010_vm10 = vweird.f32 %v1295_v38 }
 0x214   : > { %vm1011_vm12 = vmor %vm1009_vm11, %vm1010_vm10 }
 0x215   : > { %v1005_v40 = vmul.f32 %v1295_v38, %v1004_v39 }
 0x217   : > { %v1006_v41 = vmul.f32 0.5, %v1005_v40 }
 0x219   : > { %v1007_v42 = vsub.f32 1.5, %v1006_v41 }
 0x21b   : > { %v1008_v43 = vmul.f32 %v1295_v38, %v1007_v42 }
 0x21d   : > { %v1012_v45 = vsel %vm1011_vm12, %v1295_v38, %v1008_v43 }
 0x21e   : > { %v1014_v46 = vmul.f32 %v1013_v44, %v1012_v45 }
 0x220   : > { %1020 = vperm.xlu1 %1292, %v1014_v46   ;;  %v1016_v47 = vmul.f32 %v1014_v46, %v997_v31 }
 0x222   : > { %v1017_v49 = vsub.f32 %v1015_v48, %v1016_v47 }
 0x228   : > { %1028 = vperm.xlu1 %1292, %v1017_v49  }
 0x292   : > { %v1021_v50 = vpop.permute.xlu1 %1020 }
 0x293   : > { %v1023_v51 = vmul.f32 %v1021_v50, %v972_v9  ;;  %v1024_v52 = vmul.f32 %v1021_v50, %v973_v11  ;;  %v1025_v53 = vmul.f32 %v1021_v50, %v974_v19 }
 0x29a   : > { %v1029_v54 = vpop.permute.xlu1 %1028 }
 0x29b   : > { %v1031_v55 = vadd.f32 %v1029_v54, %v1023_v51  ;;  %v1032_v56 = vadd.f32 %v1029_v54, %v1024_v52  ;;  %v1033_v57 = vadd.f32 %v1029_v54, %v1025_v53 }
 0x29d   : > { %v1034_v58 = vmul.f32 0.01, %v1031_v55  ;;  %v1035_v59 = vmul.f32 0.01, %v1032_v56  ;;  %v1036_v60 = vmul.f32 0.01, %v1033_v57 }
 0x29f   : > { %v1037_v61 = vmax.f32 %v1031_v55, %v1034_v58  ;;  %v1038_v62 = vmax.f32 %v1032_v56, %v1035_v59  ;;  %v1039_v63 = vmax.f32 %v1033_v57, %v1036_v60 }
 0x2a1   : > { %1040 = vst [vmem:[%s270_s27] sm:$0xff] %v1037_v61 }
 0x2a2   : > { %1041 = vst [vmem:[%s270_s27 + $0x8] sm:$0xff] %v1038_v62 }
 0x2a3   : > { %1042 = vst [vmem:[%s270_s27 + $0x10] sm:$0xff] %v1039_v63 }
 0x2a4   : > { %1323 = shalt.err (!%p1320_p5)
}
 0x2a5   : > { %1228 = dma.vmem_to_hbm [thread:$0]  (%p1455_p4), %s1060_s29, 384, %s1062_s7, %s1044_s21  }
 0x2a6 PF: > { %p1234_p6 = scmp.ge.s32.totalorder %s1374_s23, 2  ;;  %s1073_s14 = sand.u32 1, %s1354_s18  }
 0x2a7   : > { %s1074_s16 = scalar_lea.sflag [#allocation3], %s1073_s14 }
 0x2a8   : > { %p1231_p7 = pnand %p1234_p6, %p1462_p8 }
 0x2aa   : > { %p1232_p9 = pneg %p1231_p7 }
 0x2ac   : > { %1349 = dma.done.wait (%p1232_p9), %s1074_s16, 384  }
 0x2ad   : > { %1351 = vsyncadd (%p1232_p9), %s1074_s16, 4294966912  ;;  %s18_s23 = sadd.s32 1, %s1374_s23   ;;  %s1644_s18 = smov %s1358_s19 }
 0x2ae   : > { %p15_p10 = scmp.ge.s32.totalorder %s18_s23, 4   ;;  %s1645_s19 = smov %s1362_s20 }
 0x2af   : > { %s1646_s20 = smov %s1468_s6  ;;  %s1647_s21 = smov %s1370_s22 }
 0x2b0   : > { %s1648_s22 = smov %s1650_s26  ;;  %17 = sbr.rel (!%p15_p10) target bundleno = 4 (0x4), region = 92 }
 0x2b5   :  { %1080 = vsyncpa [#allocation3], 1 }
 0x2b6   :  { %1082 = vsyncpa [#allocation3 + $0x1], 1 }

</bundles_post_ra>
